<compile_context>
chip_gen: v7x
topology: tpu7x:2x2x1
jax: 0.10.0
libtpu: 0.0.40
codegen_flags: <defaults>
</compile_context>

<pallas_src>
import math
import functools

import jax
import jax.numpy as jnp
from jax.experimental import pallas as pl
from jax.experimental.pallas import tpu as pltpu

K0, K1, K2 = 0.63576, 1.8732, 1.48695
CLIP_TO = 8.0


def _clip(x, to=CLIP_TO):
    # matches masked_fill(x < -to, -to); masked_fill(x > to, to)
    x = jnp.where(x < -to, -to, x)
    x = jnp.where(x > to, to, x)
    return x


def _round_up(v, m):
    return ((v + m - 1) // m) * m


def _kld_value(theta, log_sigma2):
    """KLD in plain JAX (f32 elementwise + reduce); stable softplus form."""
    la = _clip(log_sigma2 - jnp.log(theta * theta))
    first = K0 * jax.nn.sigmoid(K1 + K2 * la)
    # 0.5 * log(1 + exp(-la)) == 0.5 * softplus(-la), stable form with log1p
    second = 0.5 * (jnp.maximum(-la, 0.0) + jnp.log1p(jnp.exp(-jnp.abs(la))))
    return -jnp.sum(first - second - K0) / (theta.shape[0] * theta.shape[1])


# ----------------------------------------------------------------------------
# Training kernel: out = sqrt((x*x) @ sigma2 + 1e-6) * eps + x @ theta + bias
# sigma2 = exp(log_sigma2) is precomputed in the wrapper.  Two f32 VMEM
# accumulators over the K grid axis; init at k==0, finalize at k==last.
# ----------------------------------------------------------------------------
def vd_train_kernel(x_ref, theta_ref, sigma2_ref, bias_ref, eps_ref,
                    out_ref, mu_acc, var_acc):
    k = pl.program_id(2)

    @pl.when(k == 0)
    def _():
        mu_acc[...] = jnp.zeros_like(mu_acc)
        var_acc[...] = jnp.zeros_like(var_acc)

    x = x_ref[...]                                   # already compute_dtype
    mu_acc[...] += jnp.dot(x, theta_ref[...],
                           preferred_element_type=jnp.float32)
    # square after the (possible) bf16 cast of x -> no extra rounding of x*x
    var_acc[...] += jnp.dot(x * x, sigma2_ref[...],
                            preferred_element_type=jnp.float32)

    @pl.when(k == pl.num_programs(2) - 1)
    def _():
        std = jnp.sqrt(var_acc[...] + 1e-6)
        out_ref[...] = (std * eps_ref[...] + mu_acc[...]
                        + bias_ref[...]).astype(out_ref.dtype)


# ----------------------------------------------------------------------------
# Eval kernel: plain tiled GEMM with pre-masked weights: out = x @ w_m + bias
# ----------------------------------------------------------------------------
def vd_eval_kernel(x_ref, w_ref, bias_ref, out_ref, acc_ref):
    k = pl.program_id(2)

    @pl.when(k == 0)
    def _():
        acc_ref[...] = jnp.zeros_like(acc_ref)

    acc_ref[...] += jnp.dot(x_ref[...], w_ref[...],
                            preferred_element_type=jnp.float32)

    @pl.when(k == pl.num_programs(2) - 1)
    def _():
        out_ref[...] = (acc_ref[...] + bias_ref[...]).astype(out_ref.dtype)


def variational_dropout_forward(x, theta, log_sigma2, bias, eps=None,
                                training=True, threshold=3.0,
                                tm=512, tn=512, tk=512,
                                compute_dtype=jnp.bfloat16):
    """x: [B, in], theta/log_sigma2: [in, out], bias: [out], eps: [B, out]."""
    B, K = x.shape
    Kw, N = theta.shape
    assert Kw == K and bias.shape == (N,)

    # ---- tile selection -----------------------------------------------------
    # Full-dim blocks are always layout-legal; otherwise keep (8,128) alignment.
    tm = B if B <= tm else _round_up(tm, 8)
    tn = N if N <= tn else _round_up(tn, 128)
    tk = K if K <= tk else _round_up(tk, 128)

    # v7x megacore: make sure there are >= 2 parallel (i,j) tiles when possible
    # (single-TC v5e/v6e are unaffected).
    if pl.cdiv(B, tm) * pl.cdiv(N, tn) < 2:
        if N > 128:
            tn = _round_up(pl.cdiv(N, 2), 128)
        elif B > 8:
            tm = _round_up(pl.cdiv(B, 2), 8)

    grid_m, grid_n = pl.cdiv(B, tm), pl.cdiv(N, tn)

    # Only the contraction dim needs zero padding for correctness; M/N
    # remainders are handled with partial blocks + masked edge stores.
    Kp = _round_up(K, tk)
    pad_k = Kp - K
    grid = (grid_m, grid_n, Kp // tk)

    x_c = x.astype(compute_dtype)
    if pad_k:
        x_c = jnp.pad(x_c, ((0, 0), (0, pad_k)))
    bias2 = bias.reshape(1, N).astype(jnp.float32)

    x_spec = pl.BlockSpec((tm, tk), lambda i, j, k: (i, k))
    w_spec = pl.BlockSpec((tk, tn), lambda i, j, k: (k, j))
    b_spec = pl.BlockSpec((1, tn), lambda i, j, k: (0, j))
    o_spec = pl.BlockSpec((tm, tn), lambda i, j, k: (i, j))

    cparams = pltpu.CompilerParams(
        dimension_semantics=("parallel", "parallel", "arbitrary"),
        # fits v7x's 64 MiB/TC with headroom; plenty on v5e/v6e (128 MiB)
        vmem_limit_bytes=48 * 1024 * 1024)

    if not training:
        # Pre-mask + pre-cast weights once (f32 log/clip/where in the wrapper)
        # -> the kernel streams a single bf16 weight array, no per-tile EUP/VPU.
        log_alpha = _clip(log_sigma2 - jnp.log(theta * theta))
        w_m = jnp.where(log_alpha > threshold, 0.0, theta).astype(compute_dtype)
        if pad_k:
            w_m = jnp.pad(w_m, ((0, pad_k), (0, 0)))
        out = pl.pallas_call(
            vd_eval_kernel,
            out_shape=jax.ShapeDtypeStruct((B, N), jnp.float32),
            grid=grid,
            in_specs=[x_spec, w_spec, b_spec],
            out_specs=o_spec,
            scratch_shapes=[pltpu.VMEM((tm, tn), jnp.float32)],
            compiler_params=cparams,
        )(x_c, w_m, bias2)
        return out

    assert eps is not None
    # TODO(synk): optionally generate eps in-kernel via pltpu.prng_seed +
    #             pltpu.stateful_normal in the k==last finalize to drop the
    #             [B, out] HBM read; kept as an explicit input so the forward
    #             stays reproducible against the reference noise.
    theta_c = theta.astype(compute_dtype)
    sigma2_c = jnp.exp(log_sigma2).astype(compute_dtype)   # exp hoisted: once, not per tile
    if pad_k:
        theta_c = jnp.pad(theta_c, ((0, pad_k), (0, 0)))
        sigma2_c = jnp.pad(sigma2_c, ((0, pad_k), (0, 0)))
    eps_f = eps.astype(jnp.float32)

    out = pl.pallas_call(
        vd_train_kernel,
        out_shape=jax.ShapeDtypeStruct((B, N), jnp.float32),
        grid=grid,
        in_specs=[x_spec, w_spec, w_spec, b_spec, o_spec],
        out_specs=o_spec,
        scratch_shapes=[pltpu.VMEM((tm, tn), jnp.float32),
                        pltpu.VMEM((tm, tn), jnp.float32)],
        compiler_params=cparams,
    )(x_c, theta_c, sigma2_c, bias2, eps_f)

    # KLD is a small elementwise+reduce over the weights; plain JAX (XLA fuses
    # it) beats a separate tiny-tile pallas_call.
    kld = _kld_value(theta, log_sigma2)
    return out, kld


# ----------------------------------------------------------------------------
# Pure-JAX reference (faithful to the PyTorch module)
# ----------------------------------------------------------------------------
def reference_forward(x, theta, log_sigma2, bias, eps, training=True, threshold=3.0):
    log_alpha = _clip(log_sigma2 - jnp.log(theta ** 2))
    first = K0 * jax.nn.sigmoid(K1 + K2 * log_alpha)
    second = 0.5 * jnp.log(1.0 + jnp.exp(-log_alpha))
    kld = -jnp.sum(first - second - K0) / (theta.shape[0] * theta.shape[1])
    if not training:
        theta_m = jnp.where(log_alpha > threshold, 0.0, theta)
        return x @ theta_m + bias
    mu = x @ theta
    std = jnp.sqrt((x ** 2) @ jnp.exp(log_sigma2) + 1e-6)
    return std * eps + mu + bias, kld


if __name__ == "__main__":
    threshold = 3.0
    log_sigma2_init = -10.0
    key = jax.random.PRNGKey(0)

    def make_inputs(k, batch, input_size, out_size):
        k_x, k_theta, k_bias, k_eps = jax.random.split(k, 4)
        stdv = 1.0 / math.sqrt(out_size)
        theta = jax.random.uniform(k_theta, (input_size, out_size), jnp.float32,
                                   minval=-stdv, maxval=stdv)
        bias = jax.random.uniform(k_bias, (out_size,), jnp.float32,
                                  minval=-stdv, maxval=stdv)
        log_sigma2 = jnp.full((input_size, out_size), log_sigma2_init, jnp.float32)
        x = jax.random.normal(k_x, (batch, input_size), jnp.float32)
        eps = jax.random.normal(k_eps, (batch, out_size), jnp.float32)
        return x, theta, log_sigma2, bias, eps

    cases = [
        # (B, K, N, compute_dtype, (tm, tn, tk), tol, label)
        (8,  32,  64,  jnp.float32,  (512, 512, 512), 2e-2, "toy / single block, f32"),
        (64, 256, 384, jnp.bfloat16, (32, 128, 128),  3e-2, "multi-tile bf16 (K-accumulation)"),
        (50, 200, 192, jnp.bfloat16, (16, 128, 128),  3e-2, "K-padded + partial M/N edges, bf16"),
    ]

    for idx, (B, Kin, N, cdt, tiles, tol, label) in enumerate(cases):
        x, theta, ls2, bias, eps = make_inputs(jax.random.fold_in(key, idx), B, Kin, N)
        tm, tn, tk = tiles

        # training path
        out, kld = variational_dropout_forward(
            x, theta, ls2, bias, eps, training=True, threshold=threshold,
            tm=tm, tn=tn, tk=tk, compute_dtype=cdt)
        out = jax.block_until_ready(out)
        kld = jax.block_until_ready(kld)
        ref_out, ref_kld = reference_forward(x, theta, ls2, bias, eps, training=True)
        assert jnp.allclose(out, ref_out, atol=tol, rtol=tol), f"{label}: train out mismatch"
        assert jnp.allclose(kld, ref_kld, atol=1e-5, rtol=1e-4), f"{label}: kld mismatch"

        # eval path (addmm with pre-masked weights); mask computed in f32 in the
        # wrapper with the exact reference formula, so only GEMM rounding differs.
        out_eval = variational_dropout_forward(
            x, theta, ls2, bias, training=False, threshold=threshold,
            tm=tm, tn=tn, tk=tk, compute_dtype=cdt)
        out_eval = jax.block_until_ready(out_eval)
        ref_eval = reference_forward(x, theta, ls2, bias, eps, training=False,
                                     threshold=threshold)
        assert jnp.allclose(out_eval, ref_eval, atol=tol, rtol=tol), \
            f"{label}: eval out mismatch"

    print("KERNEL_OK")
</pallas_src>

<mosaic_0001>
module attributes {stable_mosaic.version = 11 : i64} {
  func.func @vd_train_kernel(%arg0: i32, %arg1: i32, %arg2: i32, %arg3: memref<8x32xf32, #tpu.memory_space<vmem>>, %arg4: memref<32x64xf32, #tpu.memory_space<vmem>>, %arg5: memref<32x64xf32, #tpu.memory_space<vmem>>, %arg6: memref<1x64xf32, #tpu.memory_space<vmem>>, %arg7: memref<8x64xf32, #tpu.memory_space<vmem>>, %arg8: memref<8x64xf32, #tpu.memory_space<vmem>>, %arg9: memref<8x64xf32, #tpu.memory_space<vmem>>, %arg10: memref<8x64xf32, #tpu.memory_space<vmem>>) attributes {dimension_semantics = [#tpu.dimension_semantics<parallel>, #tpu.dimension_semantics<parallel>, #tpu.dimension_semantics<arbitrary>], iteration_bounds = array<i64: 1, 1, 1>, scalar_prefetch = 0 : i64, scratch_operands = 2 : i64, tpu.core_type = #tpu.core_type<tc>, window_params = [{transform_indices = @transform_0, window_bounds = array<i64: 8, 32>}, {transform_indices = @transform_1, window_bounds = array<i64: 32, 64>}, {transform_indices = @transform_2, window_bounds = array<i64: 32, 64>}, {transform_indices = @transform_3, window_bounds = array<i64: 1, 64>}, {transform_indices = @transform_4, window_bounds = array<i64: 8, 64>}, {transform_indices = @transform_5, window_bounds = array<i64: 8, 64>}]} {
    %c0_i32 = arith.constant 0 : i32
    %0 = arith.cmpi eq, %arg2, %c0_i32 : i32
    %1 = arith.extui %0 : i1 to i32
    %c0_i32_0 = arith.constant 0 : i32
    %2 = arith.cmpi ne, %1, %c0_i32_0 : i32
    scf.if %2 {
      %cst_17 = arith.constant 0.000000e+00 : f32
      %18 = vector.broadcast %cst_17 : f32 to vector<8x64xf32>
      %c0_18 = arith.constant 0 : index
      %c0_19 = arith.constant 0 : index
      %19 = vector.load %arg9[%c0_18, %c0_19] : memref<8x64xf32, #tpu.memory_space<vmem>>, vector<8x64xf32>
      tpu.vector_store %arg9[%c0_18, %c0_19], %18 {strides = array<i32>} : memref<8x64xf32, #tpu.memory_space<vmem>>, vector<8x64xf32>,
      %cst_20 = arith.constant 0.000000e+00 : f32
      %20 = vector.broadcast %cst_20 : f32 to vector<8x64xf32>
      %c0_21 = arith.constant 0 : index
      %c0_22 = arith.constant 0 : index
      %21 = vector.load %arg10[%c0_21, %c0_22] : memref<8x64xf32, #tpu.memory_space<vmem>>, vector<8x64xf32>
      tpu.vector_store %arg10[%c0_21, %c0_22], %20 {strides = array<i32>} : memref<8x64xf32, #tpu.memory_space<vmem>>, vector<8x64xf32>,
    } else {
    }
    %c0 = arith.constant 0 : index
    %c0_1 = arith.constant 0 : index
    %3 = vector.load %arg3[%c0, %c0_1] : memref<8x32xf32, #tpu.memory_space<vmem>>, vector<8x32xf32>
    %c0_2 = arith.constant 0 : index
    %c0_3 = arith.constant 0 : index
    %4 = vector.load %arg9[%c0_2, %c0_3] : memref<8x64xf32, #tpu.memory_space<vmem>>, vector<8x64xf32>
    %c0_4 = arith.constant 0 : index
    %c0_5 = arith.constant 0 : index
    %5 = vector.load %arg4[%c0_4, %c0_5] : memref<32x64xf32, #tpu.memory_space<vmem>>, vector<32x64xf32>
    %cst = arith.constant dense<0.000000e+00> : vector<8x64xf32>
    %6 = tpu.matmul %3, %5, %cst {dimension_numbers = #tpu.dot_dimension_numbers<[1], [0], [0], [1], [0, 0, 1, 1], [], []>} : vector<8x32xf32>, vector<32x64xf32>, vector<8x64xf32> -> vector<8x64xf32>
    %7 = arith.addf %4, %6 : vector<8x64xf32>
    %c0_6 = arith.constant 0 : index
    %c0_7 = arith.constant 0 : index
    %8 = vector.load %arg9[%c0_6, %c0_7] : memref<8x64xf32, #tpu.memory_space<vmem>>, vector<8x64xf32>
    tpu.vector_store %arg9[%c0_6, %c0_7], %7 {strides = array<i32>} : memref<8x64xf32, #tpu.memory_space<vmem>>, vector<8x64xf32>,
    %c0_8 = arith.constant 0 : index
    %c0_9 = arith.constant 0 : index
    %9 = vector.load %arg10[%c0_8, %c0_9] : memref<8x64xf32, #tpu.memory_space<vmem>>, vector<8x64xf32>
    %10 = arith.mulf %3, %3 : vector<8x32xf32>
    %c0_10 = arith.constant 0 : index
    %c0_11 = arith.constant 0 : index
    %11 = vector.load %arg5[%c0_10, %c0_11] : memref<32x64xf32, #tpu.memory_space<vmem>>, vector<32x64xf32>
    %cst_12 = arith.constant dense<0.000000e+00> : vector<8x64xf32>
    %12 = tpu.matmul %10, %11, %cst_12 {dimension_numbers = #tpu.dot_dimension_numbers<[1], [0], [0], [1], [0, 0, 1, 1], [], []>} : vector<8x32xf32>, vector<32x64xf32>, vector<8x64xf32> -> vector<8x64xf32>
    %13 = arith.addf %9, %12 : vector<8x64xf32>
    %c0_13 = arith.constant 0 : index
    %c0_14 = arith.constant 0 : index
    %14 = vector.load %arg10[%c0_13, %c0_14] : memref<8x64xf32, #tpu.memory_space<vmem>>, vector<8x64xf32>
    tpu.vector_store %arg10[%c0_13, %c0_14], %13 {strides = array<i32>} : memref<8x64xf32, #tpu.memory_space<vmem>>, vector<8x64xf32>,
    %c0_i32_15 = arith.constant 0 : i32
    %15 = arith.cmpi eq, %arg2, %c0_i32_15 : i32
    %16 = arith.extui %15 : i1 to i32
    %c0_i32_16 = arith.constant 0 : i32
    %17 = arith.cmpi ne, %16, %c0_i32_16 : i32
    scf.if %17 {
      %c0_17 = arith.constant 0 : index
      %c0_18 = arith.constant 0 : index
      %18 = vector.load %arg10[%c0_17, %c0_18] : memref<8x64xf32, #tpu.memory_space<vmem>>, vector<8x64xf32>
      %cst_19 = arith.constant 9.99999997E-7 : f32
      %19 = vector.broadcast %cst_19 : f32 to vector<8x64xf32>
      %20 = arith.addf %18, %19 : vector<8x64xf32>
      %21 = math.sqrt %20 : vector<8x64xf32>
      %c0_20 = arith.constant 0 : index
      %c0_21 = arith.constant 0 : index
      %22 = vector.load %arg7[%c0_20, %c0_21] : memref<8x64xf32, #tpu.memory_space<vmem>>, vector<8x64xf32>
      %23 = arith.mulf %21, %22 : vector<8x64xf32>
      %c0_22 = arith.constant 0 : index
      %c0_23 = arith.constant 0 : index
      %24 = vector.load %arg9[%c0_22, %c0_23] : memref<8x64xf32, #tpu.memory_space<vmem>>, vector<8x64xf32>
      %25 = arith.addf %23, %24 : vector<8x64xf32>
      %c0_24 = arith.constant 0 : index
      %c0_25 = arith.constant 0 : index
      %26 = vector.load %arg6[%c0_24, %c0_25] : memref<1x64xf32, #tpu.memory_space<vmem>>, vector<1x64xf32>
      %27 = vector.broadcast %26 : vector<1x64xf32> to vector<8x64xf32>
      %28 = arith.addf %25, %27 : vector<8x64xf32>
      %c0_26 = arith.constant 0 : index
      %c0_27 = arith.constant 0 : index
      %29 = vector.load %arg8[%c0_26, %c0_27] : memref<8x64xf32, #tpu.memory_space<vmem>>, vector<8x64xf32>
      tpu.vector_store %arg8[%c0_26, %c0_27], %28 {strides = array<i32>} : memref<8x64xf32, #tpu.memory_space<vmem>>, vector<8x64xf32>,
    } else {
    }
    return
  }
  func.func @transform_0(%arg0: i32, %arg1: i32, %arg2: i32) -> (i32, i32) {
    %c0_i32 = arith.constant 0 : i32
    return %arg0, %arg2 : i32, i32
  }
  func.func @transform_1(%arg0: i32, %arg1: i32, %arg2: i32) -> (i32, i32) {
    %c0_i32 = arith.constant 0 : i32
    return %arg2, %arg1 : i32, i32
  }
  func.func @transform_2(%arg0: i32, %arg1: i32, %arg2: i32) -> (i32, i32) {
    %c0_i32 = arith.constant 0 : i32
    return %arg2, %arg1 : i32, i32
  }
  func.func @transform_3(%arg0: i32, %arg1: i32, %arg2: i32) -> (i32, i32) {
    %c0_i32 = arith.constant 0 : i32
    %c0_i32_0 = arith.constant 0 : i32
    return %c0_i32, %arg1 : i32, i32
  }
  func.func @transform_4(%arg0: i32, %arg1: i32, %arg2: i32) -> (i32, i32) {
    %c0_i32 = arith.constant 0 : i32
    return %arg0, %arg1 : i32, i32
  }
  func.func @transform_5(%arg0: i32, %arg1: i32, %arg2: i32) -> (i32, i32) {
    %c0_i32 = arith.constant 0 : i32
    return %arg0, %arg1 : i32, i32
  }
}

</mosaic_0001>

<bundles_post_ra>
// kernel: tpu_custom_call.1
= control target key start
LH: loop header
LB: loop body
LE: loop exit
PB: predicated region body
PF: predicated region fallthrough
CT: control target
= control target key end

     0   :  { %10 = vsyncpa [#allocation5], 0  ;;  %s528_s0 = inlined_call_operand.hbm [shape: f32[8,32], index: 0, kind: input, shape index: {}]   ;;  %s529_s1 = inlined_call_operand.hbm [shape: f32[32,64], index: 1, kind: input, shape index: {}]   ;;  %s530_s2 = inlined_call_operand.hbm [shape: f32[32,64], index: 2, kind: input, shape index: {}]   ;;  %s531_s3 = inlined_call_operand.vmem [shape: f32[1,64], index: 3, kind: input, shape index: {}]   ;;  %s532_s4 = inlined_call_operand.vmem [shape: f32[8,64], index: 4, kind: input, shape index: {}]   ;;  %s533_s5 = inlined_call_operand.hbm [shape: f32[8,64], index: 5, kind: output, shape index: {}]  }
   0x1   :  { %11 = vsyncpa [#allocation8], 0 }
   0x2   :  { %12 = vsyncpa [#allocation6], 0  ;;  %s424_s18 = smov [#allocation7]   ;;  %s330_s22 = scalar_lea.hbm %s529_s1, 512 }
   0x3   :  { %s28_s19 = sshll.u32 %s424_s18, 4  ;;  %p331_p0 = scmp.ne.s32.totalorder %s529_s1, %s330_s22  ;;  %s29_s19 = int_to_ptr.vmem [resolvable:$true] %s28_s19 }
   0x4   :  { %p334_p1 = scmp.lt.u32.totalorder %s330_s22, %s529_s1 }
   0x6   :  { %p336_p2 = pnand %p334_p1, %p331_p0 }
   0x8   :  { %339 = shalt.err (!%p336_p2)
}
   0x9   :  { %s340_s27 = scalar_lea.vmem %s29_s19, 512  ;;  %p345_p4 = scmp.lt.s32.totalorder %s29_s19, %s29_s19 }
   0xa   :  { %p341_p3 = scmp.ne.s32.totalorder %s29_s19, %s340_s27  ;;  %p346_p5 = scmp.lt.s32.totalorder %s340_s27, %s340_s27 }
   0xc   :  { %p347_p6 = por %p346_p5, %p345_p4 }
   0xe   :  { %p348_p7 = pnand %p347_p6, %p341_p3 }
  0x10   :  { %351 = shalt.err (!%p348_p7)
}
  0x11   :  { %s425_s28 = smov 128   ;;  %s426_s29 = smov 8  }
  0x12   :  { %34 = dma.hbm_to_vmem [thread:$0]  %s529_s1, 512, %s29_s19, [#allocation8], %s425_s28, %s425_s28, %s426_s29  }
  0x13   :  { %s427_s7 = smov [#allocation4]   ;;  %s428_s9 = smov [#allocation9]  }
  0x14   :  { %s19_s8 = sshll.u32 %s427_s7, 4  ;;  %s40_s10 = sshll.u32 %s428_s9, 4  ;;  %s20_s8 = int_to_ptr.vmem [resolvable:$true] %s19_s8  ;;  %s41_s10 = int_to_ptr.vmem [resolvable:$true] %s40_s10 }
  0x15   :  { %s352_s13 = scalar_lea.hbm %s528_s0, 128 }
  0x16   :  { %p353_p8 = scmp.ne.s32.totalorder %s528_s0, %s352_s13  ;;  %p356_p9 = scmp.lt.u32.totalorder %s352_s13, %s528_s0 }
  0x18   :  { %p358_p10 = pnand %p356_p9, %p353_p8 }
  0x1a   :  { %361 = shalt.err (!%p358_p10)
}
  0x1b   :  { %s362_s1 = scalar_lea.vmem %s20_s8, 128  ;;  %p367_p12 = scmp.lt.s32.totalorder %s20_s8, %s20_s8 }
  0x1c   :  { %p363_p11 = scmp.ne.s32.totalorder %s20_s8, %s362_s1  ;;  %p368_p13 = scmp.lt.s32.totalorder %s362_s1, %s362_s1 }
  0x1e   :  { %p369_p0 = por %p368_p13, %p367_p12 }
  0x20   :  { %p370_p1 = pnand %p369_p0, %p363_p11 }
  0x22   :  { %373 = shalt.err (!%p370_p1)
}
  0x23   :  { %22 = dma.hbm_to_vmem [thread:$0]  %s528_s0, 128, %s20_s8, [#allocation5]  }
  0x24   :  { %s374_s22 = scalar_lea.hbm %s530_s2, 512 }
  0x25   :  { %p375_p2 = scmp.ne.s32.totalorder %s530_s2, %s374_s22  ;;  %p378_p3 = scmp.lt.u32.totalorder %s374_s22, %s530_s2 }
  0x27   :  { %p380_p4 = pnand %p378_p3, %p375_p2 }
  0x29   :  { %383 = shalt.err (!%p380_p4)
}
  0x2a   :  { %s384_s27 = scalar_lea.vmem %s41_s10, 512  ;;  %p389_p6 = scmp.lt.s32.totalorder %s41_s10, %s41_s10 }
  0x2b   :  { %p385_p5 = scmp.ne.s32.totalorder %s41_s10, %s384_s27  ;;  %p390_p7 = scmp.lt.s32.totalorder %s384_s27, %s384_s27 }
  0x2d   :  { %p391_p8 = por %p390_p7, %p389_p6 }
  0x2f   :  { %p392_p9 = pnand %p391_p8, %p385_p5 }
  0x31   :  { %395 = shalt.err (!%p392_p9)
}
  0x32   :  { %46 = dma.hbm_to_vmem [thread:$0]  %s530_s2, 512, %s41_s10, [#allocation8], %s425_s28, %s425_s28, %s426_s29  }
  0x33   :  { %418 = dma.done.wait [#allocation5], 128  }
  0x34   :  { %419 = vsyncadd [#allocation5], 4294967168 }
  0x35   :  { %420 = dma.done.wait [#allocation8], 1024  }
  0x36   :  { %421 = vsyncadd [#allocation8], 4294966272  ;;  %vm64_vm0 = vcmask 523264   ;;  %v429_v0 = vmov 0.0|0.0   ;;  %v430_v1 = vmov 0.0   ;;  %vm431_vm1 = vmmov 0  }
  0x37   :  { %313 = vmatprep.subr.bf16.mxu1 %v429_v0  ;;  %65 = vst.msk [vmem:[#allocation2] sm:$0xff] %vm64_vm0, %v430_v1  ;;  %66 = vst.msk [vmem:[#allocation3] sm:$0xff] %vm64_vm0, %v430_v1  ;;  %304 = vmatprep.mubr.msk.f32.mxu1 %vm431_vm1, %v430_v1  ;;  %v152_v2 = vld [vmem:[#allocation9] sm:$0xff]  ;;  %v153_v3 = vld [vmem:[#allocation9 + $0x8] sm:$0xff]  ;;  %vm73_vm2 = vcmask 261120   ;;  %s432_s7 = smov [#allocation10]  }
  0x38   :  { %307 = vmatprep.subr.bf16.mxu0 %v429_v0  ;;  %293 = vmatprep.mubr.msk.f32.mxu0 %vm431_vm1, %v430_v1  ;;  %v154_v4 = vld [vmem:[#allocation9 + $0x10] sm:$0xff]  ;;  %v314_v5 = vpack.c.bf16 %v153_v3, %v152_v2  ;;  %v155_v6 = vld [vmem:[#allocation9 + $0x18] sm:$0xff]  ;;  %v69_v7 = vld [vmem:[#allocation7] sm:$0xff]  ;;  %s262_s8 = sshll.u32 %s432_s7, 4  ;;  %s263_s8 = int_to_ptr.vmem [resolvable:$true] %s262_s8 }
  0x39   :  { %v70_v8 = vld [vmem:[#allocation7 + $0x8] sm:$0xff]  ;;  %v71_v9 = vld [vmem:[#allocation7 + $0x10] sm:$0xff]  ;;  %v72_v10 = vld [vmem:[#allocation7 + $0x18] sm:$0xff]  ;;  %v317_v11 = vpack.c.bf16 %v155_v6, %v154_v4  ;;  %s396_s9 = scalar_lea.vmem %s263_s8, 128  ;;  %p401_p11 = scmp.lt.s32.totalorder %s263_s8, %s263_s8 }
  0x3a   :  { %315 = vmatpush3.bf16.msra.mxu1 %v314_v5  ;;  %v67_v12 = vld [vmem:[#allocation4] sm:$0xff]  ;;  %v308_v13 = vpack.c.bf16 %v70_v8, %v69_v7  ;;  %v311_v14 = vpack.c.bf16 %v72_v10, %v71_v9  ;;  %v243_v29 = vld [vmem:[%s532_s4] sm:$0xff]  ;;  %p397_p10 = scmp.ne.s32.totalorder %s263_s8, %s396_s9  ;;  %p402_p12 = scmp.lt.s32.totalorder %s396_s9, %s396_s9 }
  0x3b   :  { %316 = vmatprep.subr.bf16.mxu1 %v429_v0  ;;  %v151_v15 = vmul.f32 %v67_v12, %v67_v12  ;;  %v274_v34 = vld [vmem:[%s531_s3] ss:$0 sm:$0xff] }
  0x3c   :  { %309 = vmatpush3.bf16.msra.mxu0 %v308_v13  ;;  %p403_p13 = por %p402_p12, %p401_p11 }
  0x3d   :  { %310 = vmatprep.subr.bf16.mxu0 %v429_v0 }
  0x3e   :  { %318 = vmatpush3.bf16.msra.mxu1 %v317_v11  ;;  %v150_v16 = vld [vmem:[#allocation3] sm:$0xff]  ;;  %v68_v18 = vld [vmem:[#allocation2] sm:$0xff]  ;;  %p404_p0 = pnand %p403_p13, %p397_p10 }
  0x40   :  { %312 = vmatpush3.bf16.msra.mxu0 %v311_v14 }
  0x41   :  { %305 = vmatmul.mubr.msk.f32.vlgmr.msra.gmra.mrb[0].mxu1 %vm73_vm2, %v151_v15 }
  0x43   :  { %294 = vmatmul.mubr.msk.f32.vlgmr.msra.gmra.mrb[0].mxu0 %vm73_vm2, %v67_v12 }
 0x114   :  { %v225_v17 = vpop.f32.mrb[0].mxu1 }
 0x115   :  { %v229_v19 = vadd.f32 %v225_v17, %v150_v16  ;;  %v306_v20 = vpop.f32.mrb[1].mxu1 }
 0x116   :  { %v143_v21 = vpop.f32.mrb[0].mxu0 }
 0x117   :  { %230 = vst.msk [vmem:[#allocation3] sm:$0xff] %vm64_vm0, %v229_v19  ;;  %v147_v22 = vadd.f32 %v143_v21, %v68_v18  ;;  %v295_v23 = vpop.f32.mrb[1].mxu0 }
 0x119   :  { %149 = vst.msk [vmem:[#allocation2] sm:$0xff] %vm64_vm0, %v147_v22 }
 0x11e   :  { %v234_v24 = vld [vmem:[#allocation3] sm:$0xff] }
 0x11f   :  { %v235_v25 = vadd.f32 1e-06, %v234_v24 }
 0x120   :  { %v245_v32 = vld [vmem:[#allocation2] sm:$0xff] }
 0x121   :  { %328 = vrsqrt.f32 %v235_v25  ;;  %vm238_vm3 = vcmp.eq.f32.partialorder %v235_v25, inf  ;;  %v241_v28 = vand.u32 2147483648, %v235_v25  ;;  %vm240_vm4 = vcmp.eq.f32.partialorder %v235_v25, 0.0 }
 0x12b   :  { %v329_v26 = vpop.eup %328 }
 0x12c   :  { %v237_v27 = vmul.f32 %v329_v26, %v235_v25 }
 0x12e   :  { %v239_v30 = vsel %vm238_vm3, %v235_v25, %v237_v27 }
 0x12f   :  { %v242_v31 = vsel %vm240_vm4, %v241_v28, %v239_v30 }
 0x130   :  { %v244_v33 = vmul.f32 %v243_v29, %v242_v31 }
 0x132   :  { %v246_v35 = vadd.f32 %v245_v32, %v244_v33 }
 0x134   :  { %v254_v36 = vadd.f32 %v274_v34, %v246_v35 }
 0x136   :  { %255 = vst.msk [vmem:[#allocation10] sm:$0xff] %vm64_vm0, %v254_v36 }
 0x137   :  { %407 = shalt.err (!%p404_p0)
}
 0x138   :  { %s408_s11 = scalar_lea.hbm %s533_s5, 128 }
 0x139   :  { %p409_p1 = scmp.ne.s32.totalorder %s533_s5, %s408_s11  ;;  %p412_p2 = scmp.lt.u32.totalorder %s408_s11, %s533_s5 }
 0x13b   :  { %p414_p3 = pnand %p412_p2, %p409_p1 }
 0x13d   :  { %417 = shalt.err (!%p414_p3)
}
 0x13e   :  { %265 = dma.vmem_to_hbm [thread:$0]  %s263_s8, 128, %s533_s5, [#allocation6]  }
 0x13f   :  { %422 = dma.done.wait [#allocation6], 128  }
 0x140   :  { %423 = vsyncadd [#allocation6], 4294967168 }
 0x141   :  { %269 = vsyncpa [#allocation5], 1 }
 0x142   :  { %270 = vsyncpa [#allocation8], 1 }
 0x143   :  { %271 = vsyncpa [#allocation6], 1 }

</bundles_post_ra>
